<compile_context>
chip_gen: v6e
topology: v6e:2x2x1
jax: 0.10.0
libtpu: 0.0.40
codegen_flags: <defaults>
</compile_context>

<pallas_src>
import functools
import math

import jax
import jax.numpy as jnp
from jax import lax
from jax.experimental import pallas as pl
from jax.experimental.pallas import tpu as pltpu


def _round_up(n, m):
    return ((n + m - 1) // m) * m


def _pick_tile(n, cap=1024, prefer=256):
    """Largest tile <= cap that divides n, preferring multiples of `prefer`
    (256 fills the 2x256x256 MXU on v6e/v7x).  `n` must be a multiple of 128."""
    cap = min(cap, n)
    t = cap - cap % prefer
    while t >= prefer:
        if n % t == 0:
            return t
        t -= prefer
    t = cap - cap % 128
    while t >= 128:
        if n % t == 0:
            return t
        t -= 128
    return n


def _attention_kernel(wq_ref, wkv_ref, xq_ref, xk_ref, o_ref,
                      q_sc, m_sc, acc_sc, *, c_out, tk, n_valid, needs_mask):
    # wq_ref : (C_in, C_out)    q weight, transposed, 1/sqrt(C_out) folded in
    # wkv_ref: (2*C_out, C_in)  stacked [wk; wv]
    # xq_ref : (1, C_in, tq)    query-side slice of x
    # xk_ref : (1, C_in, tk)    key-side slice of x
    # o_ref  : (1, C_out, tq)
    # q_sc   : (tq, C_out) bf16 -- hoisted q projection (resident over ki)
    # m_sc   : (tq, 1) f32      -- running max
    # acc_sc : (tq, C_out+1) f32 -- unnormalized PV acc; last column = row-sum l
    ki = pl.program_id(2)

    @pl.when(ki == 0)
    def _init():
        # q depends only on (batch, query-tile): compute it once per (bi, qi)
        # and keep it resident across the whole key loop.
        xq = xq_ref[0]                                            # (C_in, tq)
        q = lax.dot_general(xq, wq_ref[...], (((0,), (0,)), ((), ())),
                            preferred_element_type=jnp.float32)   # (tq, C_out)
        q_sc[...] = q.astype(jnp.bfloat16)
        m_sc[...] = jnp.full(m_sc.shape, -jnp.inf, m_sc.dtype)
        acc_sc[...] = jnp.zeros(acc_sc.shape, acc_sc.dtype)

    # --- fused k/v 1x1-conv projections for this key tile --------------------
    kv = jnp.dot(wkv_ref[...], xk_ref[0],
                 preferred_element_type=jnp.float32)              # (2*C_out, tk)
    k = kv[:c_out, :].astype(jnp.bfloat16)                        # (C_out, tk)
    # v_ext = [v ; ones]: the trailing ones-row folds the softmax row-sum into
    # the PV matmul (last output column == sum(p)) -- no XLU lane reduction.
    v_ext = jnp.concatenate(
        [kv[c_out:, :], jnp.ones((1, tk), jnp.float32)],
        axis=0).astype(jnp.bfloat16)                              # (C_out+1, tk)

    # --- energy tile (bf16 MXU operands, f32 accumulation) -------------------
    s = jnp.dot(q_sc[...], k, preferred_element_type=jnp.float32)  # (tq, tk)

    if needs_mask:
        # Mask key columns belonging to the padded tail of the point axis.
        col = ki * tk + lax.broadcasted_iota(jnp.int32, (1, tk), 1)
        s = jnp.where(col < n_valid, s, -1e30)

    # --- online softmax over the key axis ------------------------------------
    m_prev = m_sc[...]                                            # (tq, 1)
    m_new = jnp.maximum(m_prev, jnp.max(s, axis=-1, keepdims=True))
    alpha = jnp.exp(m_prev - m_new)                               # (tq, 1)
    p = jnp.exp(s - m_new)                                        # (tq, tk) f32

    # p @ v_ext^T -> (tq, C_out+1); the big p tile is never transposed.
    pv = lax.dot_general(p.astype(jnp.bfloat16), v_ext,
                         (((1,), (1,)), ((), ())),
                         preferred_element_type=jnp.float32)      # (tq, C_out+1)
    acc_sc[...] = alpha * acc_sc[...] + pv
    m_sc[...] = m_new

    @pl.when(ki == pl.num_programs(2) - 1)
    def _finalize():
        acc = acc_sc[...]                                         # (tq, C_out+1)
        # Deferred normalization: EUP reciprocal, tq*C_out multiplies instead
        # of an (N, N) divide.
        inv_l = pl.reciprocal(acc[:, c_out:], approx=True)        # (tq, 1)
        out_qc = acc[:, :c_out] * inv_l                           # (tq, C_out)
        # Tiny (tq, C_out) -> (C_out, tq) transpose; output stays lane-dense
        # (last dim = tq, a multiple of 128).
        o_ref[0] = out_qc.T.astype(o_ref.dtype)


def attention_forward(x, wq, wk, wv, *, q_tile=None, k_tile=None):
    """x: (B, C_in, N).  wq/wk/wv: (C_out, C_in) (Conv1d k=1 weights, no bias)."""
    B, C_in, N = x.shape
    C_out = wq.shape[0]
    scale = math.sqrt(float(C_out))   # torch: sqrt(q.shape[-2]) == sqrt(C_out)

    # Pad the point axis to a tile multiple; padded key columns are masked
    # inside the kernel, so the flash-tiled O(tq*tk) footprint is preserved
    # for any N (incl. non-multiples of 128).
    N_pad = _round_up(N, 128)
    tq = q_tile if q_tile is not None else _pick_tile(N_pad, cap=1024, prefer=128)
    tk = k_tile if k_tile is not None else _pick_tile(N_pad, cap=1024, prefer=256)
    N_pad = _round_up(N_pad, math.lcm(tq, tk))
    x_p = x if N_pad == N else jnp.pad(x, ((0, 0), (0, 0), (0, N_pad - N)))

    # Trace-time weight prep: fold 1/scale into q weights, stack k/v weights.
    wq_t = (wq * (1.0 / scale)).T.astype(x.dtype)                # (C_in, C_out)
    wkv = jnp.concatenate([wk, wv], axis=0).astype(x.dtype)      # (2*C_out, C_in)

    kernel = functools.partial(_attention_kernel, c_out=C_out, tk=tk,
                               n_valid=N, needs_mask=(N_pad != N))
    grid = (B, N_pad // tq, N_pad // tk)

    out_p = pl.pallas_call(
        kernel,
        out_shape=jax.ShapeDtypeStruct((B, C_out, N_pad), x.dtype),
        grid_spec=pltpu.PrefetchScalarGridSpec(
            num_scalar_prefetch=0,
            grid=grid,
            in_specs=[
                pl.BlockSpec((C_in, C_out), lambda bi, qi, ki: (0, 0)),
                pl.BlockSpec((2 * C_out, C_in), lambda bi, qi, ki: (0, 0)),
                pl.BlockSpec((1, C_in, tq), lambda bi, qi, ki: (bi, 0, qi)),
                pl.BlockSpec((1, C_in, tk), lambda bi, qi, ki: (bi, 0, ki)),
            ],
            out_specs=pl.BlockSpec((1, C_out, tq),
                                   lambda bi, qi, ki: (bi, 0, qi)),
            scratch_shapes=[
                pltpu.VMEM((tq, C_out), jnp.bfloat16),        # hoisted q
                pltpu.VMEM((tq, 1), jnp.float32),             # running max m
                pltpu.VMEM((tq, C_out + 1), jnp.float32),     # acc (+ l column)
            ],
        ),
        compiler_params=pltpu.CompilerParams(
            dimension_semantics=("parallel", "parallel", "arbitrary"),
            vmem_limit_bytes=32 * 1024 * 1024),
    )(wq_t, wkv, x_p, x_p)

    return out_p if N_pad == N else out_p[:, :, :N]


def attention_reference(x, wq, wk, wv):
    # Pure-JAX reference mirroring the PyTorch module (f32 throughout).
    q = jnp.einsum("oc,bcn->bon", wq, x)
    k = jnp.einsum("oc,bcn->bon", wk, x)
    v = jnp.einsum("oc,bcn->bon", wv, x)
    energy = jnp.einsum("bcn,bcm->bnm", q, k)
    scale = math.sqrt(float(q.shape[-2]))
    attn = jax.nn.softmax(energy / scale, axis=-1)
    out = jnp.einsum("bnm,bcm->bcn", attn, v)
    return out


if __name__ == "__main__":
    # Module defaults: input_dim=3, output_dim=3 (1x1 Conv1d, no bias).
    # N=300 (not a multiple of 128) exercises the pad+mask path; explicit
    # 128-tiles exercise the multi-tile online-softmax path at demo size.
    B, C_in, C_out, N = 2, 3, 3, 300

    key = jax.random.PRNGKey(0)
    kx, kq, kk, kv = jax.random.split(key, 4)
    x = jax.random.normal(kx, (B, C_in, N), dtype=jnp.float32)
    bound = 1.0 / math.sqrt(C_in)   # Conv1d default init range (k=1)
    wq = jax.random.uniform(kq, (C_out, C_in), jnp.float32, -bound, bound)
    wk = jax.random.uniform(kk, (C_out, C_in), jnp.float32, -bound, bound)
    wv = jax.random.uniform(kv, (C_out, C_in), jnp.float32, -bound, bound)

    ref = attention_reference(x, wq, wk, wv)

    # Multi-tile + masked-tail path.
    out = attention_forward(x, wq, wk, wv, q_tile=128, k_tile=128)
    out = jax.block_until_ready(out)
    assert out.shape == (B, C_out, N)
    # bf16 MXU operands + approx reciprocal -> loosened tolerance vs f32 ref.
    assert jnp.allclose(out, ref, atol=2e-2, rtol=2e-2), (
        "max abs err = %s" % float(jnp.max(jnp.abs(out - ref))))

    # Default (auto-tile) path: single 384-wide tile, padded tail still masked.
    out2 = attention_forward(x, wq, wk, wv)
    out2 = jax.block_until_ready(out2)
    assert out2.shape == (B, C_out, N)
    assert jnp.allclose(out2, ref, atol=2e-2, rtol=2e-2), (
        "max abs err = %s" % float(jnp.max(jnp.abs(out2 - ref))))

    print("KERNEL_OK")
</pallas_src>

<mosaic_0001>
module attributes {stable_mosaic.version = 11 : i64} {
  func.func @_attention_kernel(%arg0: i32, %arg1: i32, %arg2: i32, %arg3: memref<3x3xf32, #tpu.memory_space<vmem>>, %arg4: memref<6x3xf32, #tpu.memory_space<vmem>>, %arg5: memref<1x3x128xf32, #tpu.memory_space<vmem>>, %arg6: memref<1x3x128xf32, #tpu.memory_space<vmem>>, %arg7: memref<1x3x128xf32, #tpu.memory_space<vmem>>, %arg8: memref<128x3xbf16, #tpu.memory_space<vmem>>, %arg9: memref<128x1xf32, #tpu.memory_space<vmem>>, %arg10: memref<128x4xf32, #tpu.memory_space<vmem>>) attributes {dimension_semantics = [#tpu.dimension_semantics<parallel>, #tpu.dimension_semantics<parallel>, #tpu.dimension_semantics<arbitrary>], iteration_bounds = array<i64: 2, 3, 3>, scalar_prefetch = 0 : i64, scratch_operands = 3 : i64, tpu.core_type = #tpu.core_type<tc>, window_params = [{pipeline_mode = #tpu.pipeline_mode<synchronous>, transform_indices = @transform_0, window_bounds = array<i64: 3, 3>}, {pipeline_mode = #tpu.pipeline_mode<synchronous>, transform_indices = @transform_1, window_bounds = array<i64: 6, 3>}, {transform_indices = @transform_2, window_bounds = array<i64: 1, 3, 128>}, {transform_indices = @transform_3, window_bounds = array<i64: 1, 3, 128>}, {transform_indices = @transform_4, window_bounds = array<i64: 1, 3, 128>}]} {
    %c0_i32 = arith.constant 0 : i32
    %0 = arith.cmpi eq, %arg2, %c0_i32 : i32
    %1 = arith.extui %0 : i1 to i32
    %c0_i32_0 = arith.constant 0 : i32
    %2 = arith.cmpi ne, %1, %c0_i32_0 : i32
    scf.if %2 {
      %c0_21 = arith.constant 0 : index
      %c0_22 = arith.constant 0 : index
      %c0_23 = arith.constant 0 : index
      %45 = vector.load %arg5[%c0_21, %c0_22, %c0_23] : memref<1x3x128xf32, #tpu.memory_space<vmem>>, vector<1x3x128xf32>
      %46 = vector.shape_cast %45 : vector<1x3x128xf32> to vector<3x128xf32>
      %c0_24 = arith.constant 0 : index
      %c0_25 = arith.constant 0 : index
      %47 = vector.load %arg3[%c0_24, %c0_25] : memref<3x3xf32, #tpu.memory_space<vmem>>, vector<3x3xf32>
      %cst_26 = arith.constant dense<0.000000e+00> : vector<128x3xf32>
      %48 = tpu.matmul %46, %47, %cst_26 {dimension_numbers = #tpu.dot_dimension_numbers<[0], [0], [1], [1], [0, 1, 1, 1], [], []>} : vector<3x128xf32>, vector<3x3xf32>, vector<128x3xf32> -> vector<128x3xf32>
      %49 = arith.truncf %48 : vector<128x3xf32> to vector<128x3xbf16>
      %c0_27 = arith.constant 0 : index
      %c0_28 = arith.constant 0 : index
      %50 = vector.load %arg8[%c0_27, %c0_28] : memref<128x3xbf16, #tpu.memory_space<vmem>>, vector<128x3xbf16>
      tpu.vector_store %arg8[%c0_27, %c0_28], %49 {strides = array<i32>} : memref<128x3xbf16, #tpu.memory_space<vmem>>, vector<128x3xbf16>,
      %cst_29 = arith.constant 0xFF800000 : f32
      %51 = vector.broadcast %cst_29 : f32 to vector<128x1xf32>
      %c0_30 = arith.constant 0 : index
      %c0_31 = arith.constant 0 : index
      %52 = vector.load %arg9[%c0_30, %c0_31] : memref<128x1xf32, #tpu.memory_space<vmem>>, vector<128x1xf32>
      tpu.vector_store %arg9[%c0_30, %c0_31], %51 {strides = array<i32>} : memref<128x1xf32, #tpu.memory_space<vmem>>, vector<128x1xf32>,
      %cst_32 = arith.constant 0.000000e+00 : f32
      %53 = vector.broadcast %cst_32 : f32 to vector<128x4xf32>
      %c0_33 = arith.constant 0 : index
      %c0_34 = arith.constant 0 : index
      %54 = vector.load %arg10[%c0_33, %c0_34] : memref<128x4xf32, #tpu.memory_space<vmem>>, vector<128x4xf32>
      tpu.vector_store %arg10[%c0_33, %c0_34], %53 {strides = array<i32>} : memref<128x4xf32, #tpu.memory_space<vmem>>, vector<128x4xf32>,
    } else {
    }
    %c0 = arith.constant 0 : index
    %c0_1 = arith.constant 0 : index
    %3 = vector.load %arg4[%c0, %c0_1] : memref<6x3xf32, #tpu.memory_space<vmem>>, vector<6x3xf32>
    %c0_2 = arith.constant 0 : index
    %c0_3 = arith.constant 0 : index
    %c0_4 = arith.constant 0 : index
    %4 = vector.load %arg6[%c0_2, %c0_3, %c0_4] : memref<1x3x128xf32, #tpu.memory_space<vmem>>, vector<1x3x128xf32>
    %5 = vector.shape_cast %4 : vector<1x3x128xf32> to vector<3x128xf32>
    %cst = arith.constant dense<0.000000e+00> : vector<6x128xf32>
    %6 = tpu.matmul %3, %5, %cst {dimension_numbers = #tpu.dot_dimension_numbers<[1], [0], [0], [1], [0, 0, 1, 1], [], []>} : vector<6x3xf32>, vector<3x128xf32>, vector<6x128xf32> -> vector<6x128xf32>
    %7 = vector.extract_strided_slice %6 {offsets = [0, 0], sizes = [3, 128], strides = [1, 1]} : vector<6x128xf32> to vector<3x128xf32>
    %8 = arith.truncf %7 : vector<3x128xf32> to vector<3x128xbf16>
    %9 = vector.extract_strided_slice %6 {offsets = [3, 0], sizes = [3, 128], strides = [1, 1]} : vector<6x128xf32> to vector<3x128xf32>
    %cst_5 = arith.constant 1.000000e+00 : f32
    %10 = vector.broadcast %cst_5 : f32 to vector<1x128xf32>
    %11 = tpu.concatenate %9, %10 in 0 : vector<3x128xf32>, vector<1x128xf32> -> vector<4x128xf32>
    %12 = arith.truncf %11 : vector<4x128xf32> to vector<4x128xbf16>
    %c0_6 = arith.constant 0 : index
    %c0_7 = arith.constant 0 : index
    %13 = vector.load %arg8[%c0_6, %c0_7] : memref<128x3xbf16, #tpu.memory_space<vmem>>, vector<128x3xbf16>
    %cst_8 = arith.constant dense<0.000000e+00> : vector<128x128xf32>
    %14 = tpu.matmul %13, %8, %cst_8 {dimension_numbers = #tpu.dot_dimension_numbers<[1], [0], [0], [1], [0, 0, 1, 1], [], []>} : vector<128x3xbf16>, vector<3x128xbf16>, vector<128x128xf32> -> vector<128x128xf32>
    %c128_i32 = arith.constant 128 : i32
    %15 = arith.muli %arg2, %c128_i32 : i32
    %16 = tpu.iota {dimensions = array<i32: 1>} : vector<1x128xi32>
    %17 = vector.broadcast %15 : i32 to vector<1x128xi32>
    %18 = arith.addi %17, %16 : vector<1x128xi32>
    %c300_i32 = arith.constant 300 : i32
    %19 = vector.broadcast %c300_i32 : i32 to vector<1x128xi32>
    %20 = arith.cmpi slt, %18, %19 : vector<1x128xi32>
    %cst_9 = arith.constant -1.000000e+30 : f32
    %21 = vector.shape_cast %20 : vector<1x128xi1> to vector<1x128xi1>
    %22 = vector.broadcast %21 : vector<1x128xi1> to vector<128x128xi1>
    %23 = vector.broadcast %cst_9 : f32 to vector<128x128xf32>
    %24 = arith.select %22, %14, %23 : vector<128x128xi1>, vector<128x128xf32>
    %c0_10 = arith.constant 0 : index
    %c0_11 = arith.constant 0 : index
    %25 = vector.load %arg9[%c0_10, %c0_11] : memref<128x1xf32, #tpu.memory_space<vmem>>, vector<128x1xf32>
    %cst_12 = arith.constant dense<0xFF800000> : vector<128xf32>
    %26 = vector.multi_reduction <maximumf>, %24, %cst_12 [1] : vector<128x128xf32> to vector<128xf32>
    %27 = vector.shape_cast %26 : vector<128xf32> to vector<128x1xf32>
    %28 = arith.maximumf %25, %27 : vector<128x1xf32>
    %29 = arith.subf %25, %28 : vector<128x1xf32>
    %30 = math.exp %29 : vector<128x1xf32>
    %31 = vector.broadcast %28 : vector<128x1xf32> to vector<128x128xf32>
    %32 = arith.subf %24, %31 : vector<128x128xf32>
    %33 = math.exp %32 : vector<128x128xf32>
    %34 = arith.truncf %33 : vector<128x128xf32> to vector<128x128xbf16>
    %cst_13 = arith.constant dense<0.000000e+00> : vector<128x4xf32>
    %35 = tpu.matmul %34, %12, %cst_13 {dimension_numbers = #tpu.dot_dimension_numbers<[1], [1], [0], [0], [0, 0, 1, 0], [], []>} : vector<128x128xbf16>, vector<4x128xbf16>, vector<128x4xf32> -> vector<128x4xf32>
    %c0_14 = arith.constant 0 : index
    %c0_15 = arith.constant 0 : index
    %36 = vector.load %arg10[%c0_14, %c0_15] : memref<128x4xf32, #tpu.memory_space<vmem>>, vector<128x4xf32>
    %37 = vector.broadcast %30 : vector<128x1xf32> to vector<128x4xf32>
    %38 = arith.mulf %37, %36 : vector<128x4xf32>
    %39 = arith.addf %38, %35 : vector<128x4xf32>
    %c0_16 = arith.constant 0 : index
    %c0_17 = arith.constant 0 : index
    %40 = vector.load %arg10[%c0_16, %c0_17] : memref<128x4xf32, #tpu.memory_space<vmem>>, vector<128x4xf32>
    tpu.vector_store %arg10[%c0_16, %c0_17], %39 {strides = array<i32>} : memref<128x4xf32, #tpu.memory_space<vmem>>, vector<128x4xf32>,
    %c0_18 = arith.constant 0 : index
    %c0_19 = arith.constant 0 : index
    %41 = vector.load %arg9[%c0_18, %c0_19] : memref<128x1xf32, #tpu.memory_space<vmem>>, vector<128x1xf32>
    tpu.vector_store %arg9[%c0_18, %c0_19], %28 {strides = array<i32>} : memref<128x1xf32, #tpu.memory_space<vmem>>, vector<128x1xf32>,
    %c2_i32 = arith.constant 2 : i32
    %42 = arith.cmpi eq, %arg2, %c2_i32 : i32
    %43 = arith.extui %42 : i1 to i32
    %c0_i32_20 = arith.constant 0 : i32
    %44 = arith.cmpi ne, %43, %c0_i32_20 : i32
    scf.if %44 {
      %c0_21 = arith.constant 0 : index
      %c0_22 = arith.constant 0 : index
      %45 = vector.load %arg10[%c0_21, %c0_22] : memref<128x4xf32, #tpu.memory_space<vmem>>, vector<128x4xf32>
      %46 = vector.extract_strided_slice %45 {offsets = [0, 3], sizes = [128, 1], strides = [1, 1]} : vector<128x4xf32> to vector<128x1xf32>
      %47 = tpu.reciprocal %46 {approx = true} : vector<128x1xf32> -> vector<128x1xf32>
      %48 = vector.extract_strided_slice %45 {offsets = [0, 0], sizes = [128, 3], strides = [1, 1]} : vector<128x4xf32> to vector<128x3xf32>
      %49 = vector.broadcast %47 : vector<128x1xf32> to vector<128x3xf32>
      %50 = arith.mulf %48, %49 : vector<128x3xf32>
      %51 = tpu.transpose %50, [1, 0] : vector<128x3xf32> -> vector<3x128xf32>
      %c0_23 = arith.constant 0 : index
      %c0_24 = arith.constant 0 : index
      %c0_25 = arith.constant 0 : index
      %52 = vector.load %arg7[%c0_23, %c0_24, %c0_25] : memref<1x3x128xf32, #tpu.memory_space<vmem>>, vector<1x3x128xf32>
      %53 = vector.shape_cast %52 : vector<1x3x128xf32> to vector<3x128xf32>
      %54 = vector.shape_cast %51 : vector<3x128xf32> to vector<1x3x128xf32>
      tpu.vector_store %arg7[%c0_23, %c0_24, %c0_25], %54 {strides = array<i32>} : memref<1x3x128xf32, #tpu.memory_space<vmem>>, vector<1x3x128xf32>,
    } else {
    }
    return
  }
  func.func @transform_0(%arg0: i32, %arg1: i32, %arg2: i32) -> (i32, i32) {
    %c0_i32 = arith.constant 0 : i32
    %c0_i32_0 = arith.constant 0 : i32
    %c0_i32_1 = arith.constant 0 : i32
    return %c0_i32, %c0_i32_0 : i32, i32
  }
  func.func @transform_1(%arg0: i32, %arg1: i32, %arg2: i32) -> (i32, i32) {
    %c0_i32 = arith.constant 0 : i32
    %c0_i32_0 = arith.constant 0 : i32
    %c0_i32_1 = arith.constant 0 : i32
    return %c0_i32, %c0_i32_0 : i32, i32
  }
  func.func @transform_2(%arg0: i32, %arg1: i32, %arg2: i32) -> (i32, i32, i32) {
    %c0_i32 = arith.constant 0 : i32
    %c0_i32_0 = arith.constant 0 : i32
    return %arg0, %c0_i32, %arg1 : i32, i32, i32
  }
  func.func @transform_3(%arg0: i32, %arg1: i32, %arg2: i32) -> (i32, i32, i32) {
    %c0_i32 = arith.constant 0 : i32
    %c0_i32_0 = arith.constant 0 : i32
    return %arg0, %c0_i32, %arg2 : i32, i32, i32
  }
  func.func @transform_4(%arg0: i32, %arg1: i32, %arg2: i32) -> (i32, i32, i32) {
    %c0_i32 = arith.constant 0 : i32
    %c0_i32_0 = arith.constant 0 : i32
    return %arg0, %c0_i32, %arg1 : i32, i32, i32
  }
}

</mosaic_0001>

<bundles_post_ra>
// kernel: tpu_custom_call.1
= control target key start
LH: loop header
LB: loop body
LE: loop exit
PB: predicated region body
PF: predicated region fallthrough
CT: control target
= control target key end

     0   :  { %s2141_s15 = smov 0   ;;  %s2143_s16 = smov 0   ;;  %s2563_s0 = inlined_call_operand.vmem [shape: f32[3,3], index: 0, kind: input, shape index: {}]   ;;  %s2564_s1 = inlined_call_operand.vmem [shape: f32[6,3], index: 1, kind: input, shape index: {}]   ;;  %s2565_s2 = inlined_call_operand.vmem [shape: f32[2,3,384], index: 2, kind: input, shape index: {}]   ;;  %s2566_s3 = inlined_call_operand.vmem [shape: f32[2,3,384], index: 3, kind: input, shape index: {}]   ;;  %s2567_s4 = inlined_call_operand.vmem [shape: f32[2,3,384], index: 4, kind: output, shape index: {}]  }
   0x1   :  { %s2145_s17 = smov 0   ;;  %s2147_s18 = smov 0  }
   0x2   :  { %s2149_s19 = smov 0   ;;  %s2151_s20 = smov 0  }
   0x3   :  { %s2153_s21 = smov 0  }
   0x4 LB: > { %s26_s22 = sadd.s32 1, %s2095_s18  ;;  %s29_s23 = sadd.s32 1, %s2099_s19  ;;  %s2107_s21 = sphi %s2153_s21, %s14_s21   ;;  %s2103_s20 = sphi %s2151_s20, %s2573_s20   ;;  %s2099_s19 = sphi %s2149_s19, %s2572_s19   ;;  %s2095_s18 = sphi %s2147_s18, %s2571_s18   ;;  %s2091_s17 = sphi %s2145_s17, %s2570_s17   ;;  %s2087_s16 = sphi %s2143_s16, %s2569_s16   ;;  %s2083_s15 = sphi %s2141_s15, %s2568_s15  }
   0x5   : > { %p27_p0 = scmp.ge.s32.totalorder %s26_s22, 3  ;;  %p1699_p1 = scmp.ge.s32.totalorder %s2107_s21, 1 }
   0x6   : > { %p203_p2 = scmp.lt.s32.totalorder %s2107_s21, 19  ;;  %s33_s24 = sadd.s32 1, %s2103_s20 }
   0x7   : > { %s2575_s22 = smov (%p27_p0, %s26_s22), 0  ;;  %s2577_s23 = smov (!%p27_p0, %s29_s23), %s2099_s19 }
   0x8   : > { %p204_p3 = pnand %p1699_p1, %p203_p2  ;;  %p31_p4 = scmp.ge.s32.totalorder %s2577_s23, 3 }
   0x9   : > { %p243_p6 = scmp.lt.s32.totalorder (!%p204_p3), %s2091_s17, 1  ;;  %p245_p7 = scmp.lt.s32.totalorder (!%p204_p3), %s2087_s16, 2 }
   0xa   : > { %s2579_s23 = smov (%p31_p4, %s2577_s23), 0  ;;  %s2581_s24 = smov (!%p31_p4, %s33_s24), %s2103_s20 }
   0xb   : > { %p35_p5 = scmp.ge.s32.totalorder %s2581_s24, 2  ;;  %207 = sbr.rel (%p204_p3) target bundleno = 1602 (0x642), region = 36 }
   0xc   : > { %p253_p8 = scmp.lt.s32.totalorder (!%p204_p3), %s2083_s15, 2  ;;  %p1703_p9 = scmp.ne.s32.totalorder (!%p204_p3), %s2083_s15, 0 }
   0xd   : > { %s2583_s24 = smov (%p35_p5, %s2581_s24), 0 }
  0x10   : > { %s2585_s17 = smov (!%p243_p6, %s2091_s17), 1  ;;  %s2587_s16 = smov (!%p245_p7, %s2087_s16), 2 }
  0x11   : > { %s1881_s25 = smul.u32 3, %s2585_s17 }
  0x12   : > { %s254_s26 = scalar_select %p253_p8, %s2083_s15, 2 }
  0x13   : > { %s248_s27 = sadd.s32 %s1881_s25, %s2587_s16  ;;  %271 = sbr.rel (%p1703_p9) target bundleno = 408 (0x198), region = 40 }
  0x14   : > { %s1700_s28 = sshll.u32 %s248_s27, 2  ;;  %s256_s29 = sadd.s32 %s1881_s25, %s254_s26 }
  0x15   : > { %s250_s6 = scalar_lea.vmem %s2565_s2, %s1700_s28  ;;  %s1701_s7 = sshll.u32 %s256_s29, 2 }
  0x16   : > { %s2193_s10 = scalar_lea.vmem %s2566_s3, %s1701_s7  ;;  %s2198_s13 = scalar_lea.vmem %s2567_s4, %s1700_s28 }
  0x18   : > { %v272_v0 = vld [vmem:[%s250_s6] sm:$0x7]  ;;  %vm355_vm0 = vcmask 1042432   ;;  %vm306_vm1 = vcmask 23552   ;;  %vm585_vm2 = vcmask 7168   ;;  %vm602_vm3 = vcmask 31744  }
  0x19   : > { %v273_v1 = vld [vmem:[%s2563_s0] sm:$0x7]  ;;  %274 = vxpose.xlu0.b32.start.end [1/1] (short) %v272_v0, 128  ;;  %v2109_v18 = vmov -inf   ;;  %v2110_v19 = vmov 0.0   ;;  %vm568_vm4 = vcmask 19456  }
  0x1a   : > { %1812 = vmatprep.subr.msk.mxu0 %vm355_vm0, %v273_v1  ;;  %1879 = vmatprep.subr.msk.mxu1 %vm355_vm0, %v273_v1  ;;  %586 = vst.msk [vmem:[#allocation3] sm:$0xff] %vm585_vm2, %v2109_v18  ;;  %587 = vst.msk [vmem:[#allocation3 + $0x8] sm:$0xff] %vm585_vm2, %v2109_v18 }
  0x1b   : > { %1813 = vmatpush3.msk.msra.mxu0 %vm355_vm0, %v273_v1  ;;  %1880 = vmatpush3.msk.msra.mxu1 %vm355_vm0, %v273_v1  ;;  %588 = vst.msk [vmem:[#allocation3 + $0x10] sm:$0xff] %vm585_vm2, %v2109_v18  ;;  %589 = vst.msk [vmem:[#allocation3 + $0x18] sm:$0xff] %vm585_vm2, %v2109_v18 }
  0x1c   : > { %590 = vst.msk [vmem:[#allocation3 + $0x20] sm:$0xff] %vm585_vm2, %v2109_v18  ;;  %591 = vst.msk [vmem:[#allocation3 + $0x28] sm:$0xff] %vm585_vm2, %v2109_v18 }
  0x1d   : > { %592 = vst.msk [vmem:[#allocation3 + $0x30] sm:$0xff] %vm585_vm2, %v2109_v18  ;;  %593 = vst.msk [vmem:[#allocation3 + $0x38] sm:$0xff] %vm585_vm2, %v2109_v18 }
  0x1e   : > { %594 = vst.msk [vmem:[#allocation3 + $0x40] sm:$0xff] %vm585_vm2, %v2109_v18  ;;  %595 = vst.msk [vmem:[#allocation3 + $0x48] sm:$0xff] %vm585_vm2, %v2109_v18 }
  0x1f   : > { %596 = vst.msk [vmem:[#allocation3 + $0x50] sm:$0xff] %vm585_vm2, %v2109_v18  ;;  %597 = vst.msk [vmem:[#allocation3 + $0x58] sm:$0xff] %vm585_vm2, %v2109_v18 }
  0x20   : > { %598 = vst.msk [vmem:[#allocation3 + $0x60] sm:$0xff] %vm585_vm2, %v2109_v18  ;;  %599 = vst.msk [vmem:[#allocation3 + $0x68] sm:$0xff] %vm585_vm2, %v2109_v18 }
  0x21   : > { %600 = vst.msk [vmem:[#allocation3 + $0x70] sm:$0xff] %vm585_vm2, %v2109_v18  ;;  %601 = vst.msk [vmem:[#allocation3 + $0x78] sm:$0xff] %vm585_vm2, %v2109_v18 }
  0x22   : > { %603 = vst.msk [vmem:[#allocation4] sm:$0xff] %vm602_vm3, %v2110_v19  ;;  %604 = vst.msk [vmem:[#allocation4 + $0x8] sm:$0xff] %vm602_vm3, %v2110_v19 }
  0x23   : > { %605 = vst.msk [vmem:[#allocation4 + $0x10] sm:$0xff] %vm602_vm3, %v2110_v19  ;;  %606 = vst.msk [vmem:[#allocation4 + $0x18] sm:$0xff] %vm602_vm3, %v2110_v19 }
  0x24   : > { %607 = vst.msk [vmem:[#allocation4 + $0x20] sm:$0xff] %vm602_vm3, %v2110_v19  ;;  %608 = vst.msk [vmem:[#allocation4 + $0x28] sm:$0xff] %vm602_vm3, %v2110_v19 }
  0x25   : > { %609 = vst.msk [vmem:[#allocation4 + $0x30] sm:$0xff] %vm602_vm3, %v2110_v19  ;;  %610 = vst.msk [vmem:[#allocation4 + $0x38] sm:$0xff] %vm602_vm3, %v2110_v19 }
  0x26   : > { %611 = vst.msk [vmem:[#allocation4 + $0x40] sm:$0xff] %vm602_vm3, %v2110_v19  ;;  %612 = vst.msk [vmem:[#allocation4 + $0x48] sm:$0xff] %vm602_vm3, %v2110_v19 }
  0x27   : > { %613 = vst.msk [vmem:[#allocation4 + $0x50] sm:$0xff] %vm602_vm3, %v2110_v19  ;;  %614 = vst.msk [vmem:[#allocation4 + $0x58] sm:$0xff] %vm602_vm3, %v2110_v19 }
  0x28   : > { %615 = vst.msk [vmem:[#allocation4 + $0x60] sm:$0xff] %vm602_vm3, %v2110_v19  ;;  %616 = vst.msk [vmem:[#allocation4 + $0x68] sm:$0xff] %vm602_vm3, %v2110_v19 }
  0x29   : > { %617 = vst.msk [vmem:[#allocation4 + $0x70] sm:$0xff] %vm602_vm3, %v2110_v19  ;;  %618 = vst.msk [vmem:[#allocation4 + $0x78] sm:$0xff] %vm602_vm3, %v2110_v19 }
  0x95   : > { %v290_v2 = vpop.trf.xlu0 }
  0x96   : > { %1814 = vmatprep.mubr.msk.f32.mxu0 %vm306_vm1, %v290_v2 }
  0x99   : > { %v291_v3 = vpop.trf.xlu0 }
  0x9a   : > { %1815 = vmatmul.mubr.msk.f32.vlgmr.msra.gmra.mxu0 %vm306_vm1, %v291_v3 }
  0x9d   : > { %v292_v4 = vpop.trf.xlu0 }
  0x9e   : > { %1817 = vmatprep.mubr.msk.f32.mxu0 %vm306_vm1, %v292_v4 }
  0xa1   : > { %v293_v5 = vpop.trf.xlu0 }
  0xa2   : > { %1818 = vmatmul.mubr.msk.f32.gmra.mxu0 %vm306_vm1, %v293_v5 }
  0xa5   : > { %v294_v6 = vpop.trf.xlu0 }
  0xa6   : > { %1820 = vmatprep.mubr.msk.f32.mxu0 %vm306_vm1, %v294_v6 }
  0xa9   : > { %v295_v7 = vpop.trf.xlu0 }
  0xaa   : > { %1821 = vmatmul.mubr.msk.f32.gmra.mxu0 %vm306_vm1, %v295_v7 }
  0xad   : > { %v296_v8 = vpop.trf.xlu0 }
  0xae   : > { %1823 = vmatprep.mubr.msk.f32.mxu0 %vm306_vm1, %v296_v8 }
  0xb1   : > { %v297_v9 = vpop.trf.xlu0 }
  0xb2   : > { %1824 = vmatmul.mubr.msk.f32.gmra.mxu0 %vm306_vm1, %v297_v9 }
  0xb5   : > { %v298_v10 = vpop.trf.xlu0 }
  0xb6   : > { %1826 = vmatprep.mubr.msk.f32.mxu1 %vm306_vm1, %v298_v10 }
  0xb9   : > { %v299_v11 = vpop.trf.xlu0 }
  0xba   : > { %1827 = vmatmul.mubr.msk.f32.vlgmr.msra.gmra.mxu1 %vm306_vm1, %v299_v11 }
  0xbd   : > { %v300_v12 = vpop.trf.xlu0 }
  0xbe   : > { %1829 = vmatprep.mubr.msk.f32.mxu1 %vm306_vm1, %v300_v12 }
  0xc1   : > { %v301_v13 = vpop.trf.xlu0 }
  0xc2   : > { %1830 = vmatmul.mubr.msk.f32.gmra.mxu1 %vm306_vm1, %v301_v13 }
  0xc5   : > { %v302_v14 = vpop.trf.xlu0 }
  0xc6   : > { %1832 = vmatprep.mubr.msk.f32.mxu1 %vm306_vm1, %v302_v14 }
  0xc9   : > { %v303_v15 = vpop.trf.xlu0 }
  0xca   : > { %1833 = vmatmul.mubr.msk.f32.gmra.mxu1 %vm306_vm1, %v303_v15 }
  0xcd   : > { %v304_v16 = vpop.trf.xlu0 }
  0xce   : > { %1835 = vmatprep.mubr.msk.f32.mxu1 %vm306_vm1, %v304_v16 }
  0xd1   : > { %v305_v17 = vpop.trf.xlu0 }
  0xd2   : > { %1836 = vmatmul.mubr.msk.f32.gmra.mxu1 %vm306_vm1, %v305_v17 }
 0x15a   : > { %v1816_v20 = vpop.f32.mrf.mxu0 }
 0x15b   : > { %v1760_v21 = vpack.c.bf16 %v1816_v20, %v1816_v20 }
 0x15c   : > { %v425_v22 = vpop.f32.mrf.mxu0 }
 0x15d   : > { %570 = vst.msk [vmem:[#allocation2 + $0x4] sm:$0xf] %vm568_vm4, %v1760_v21  ;;  %v1759_v23 = vpack.c.bf16 %v425_v22, %v425_v22 }
 0x15f   : > { %569 = vst.msk [vmem:[#allocation2] sm:$0xf] %vm568_vm4, %v1759_v23 }
 0x162   : > { %v1819_v24 = vpop.f32.mrf.mxu0 }
 0x163   : > { %v1762_v25 = vpack.c.bf16 %v1819_v24, %v1819_v24 }
 0x164   : > { %v435_v26 = vpop.f32.mrf.mxu0 }
 0x165   : > { %572 = vst.msk [vmem:[#allocation2 + $0xc] sm:$0xf] %vm568_vm4, %v1762_v25  ;;  %v1761_v27 = vpack.c.bf16 %v435_v26, %v435_v26 }
 0x167   : > { %571 = vst.msk [vmem:[#allocation2 + $0x8] sm:$0xf] %vm568_vm4, %v1761_v27 }
 0x16a   : > { %v1822_v28 = vpop.f32.mrf.mxu0 }
 0x16b   : > { %v1764_v29 = vpack.c.bf16 %v1822_v28, %v1822_v28 }
 0x16c   : > { %v445_v30 = vpop.f32.mrf.mxu0 }
 0x16d   : > { %574 = vst.msk [vmem:[#allocation2 + $0x14] sm:$0xf] %vm568_vm4, %v1764_v29  ;;  %v1763_v31 = vpack.c.bf16 %v445_v30, %v445_v30 }
 0x16f   : > { %573 = vst.msk [vmem:[#allocation2 + $0x10] sm:$0xf] %vm568_vm4, %v1763_v31 }
 0x172   : > { %v1825_v32 = vpop.f32.mrf.mxu0 }
 0x173   : > { %v1766_v33 = vpack.c.bf16 %v1825_v32, %v1825_v32 }
 0x174   : > { %v455_v34 = vpop.f32.mrf.mxu0 }
 0x175   : > { %576 = vst.msk [vmem:[#allocation2 + $0x1c] sm:$0xf] %vm568_vm4, %v1766_v33  ;;  %v1765_v35 = vpack.c.bf16 %v455_v34, %v455_v34 }
 0x177   : > { %575 = vst.msk [vmem:[#allocation2 + $0x18] sm:$0xf] %vm568_vm4, %v1765_v35 }
 0x17a   : > { %v1828_v36 = vpop.f32.mrf.mxu1 }
 0x17b   : > { %v1768_v37 = vpack.c.bf16 %v1828_v36, %v1828_v36 }
 0x17c   : > { %v465_v38 = vpop.f32.mrf.mxu1 }
 0x17d   : > { %578 = vst.msk [vmem:[#allocation2 + $0x24] sm:$0xf] %vm568_vm4, %v1768_v37  ;;  %v1767_v39 = vpack.c.bf16 %v465_v38, %v465_v38 }
 0x17f   : > { %577 = vst.msk [vmem:[#allocation2 + $0x20] sm:$0xf] %vm568_vm4, %v1767_v39 }
 0x182   : > { %v1831_v40 = vpop.f32.mrf.mxu1 }
 0x183   : > { %v1770_v41 = vpack.c.bf16 %v1831_v40, %v1831_v40 }
 0x184   : > { %v475_v42 = vpop.f32.mrf.mxu1 }
 0x185   : > { %580 = vst.msk [vmem:[#allocation2 + $0x2c] sm:$0xf] %vm568_vm4, %v1770_v41  ;;  %v1769_v43 = vpack.c.bf16 %v475_v42, %v475_v42 }
 0x187   : > { %579 = vst.msk [vmem:[#allocation2 + $0x28] sm:$0xf] %vm568_vm4, %v1769_v43 }
 0x18a   : > { %v1834_v44 = vpop.f32.mrf.mxu1 }
 0x18b   : > { %v1772_v45 = vpack.c.bf16 %v1834_v44, %v1834_v44 }
 0x18c   : > { %v485_v46 = vpop.f32.mrf.mxu1 }
 0x18d   : > { %582 = vst.msk [vmem:[#allocation2 + $0x34] sm:$0xf] %vm568_vm4, %v1772_v45  ;;  %v1771_v47 = vpack.c.bf16 %v485_v46, %v485_v46 }
 0x18f   : > { %581 = vst.msk [vmem:[#allocation2 + $0x30] sm:$0xf] %vm568_vm4, %v1771_v47 }
 0x192   : > { %v1837_v48 = vpop.f32.mrf.mxu1 }
 0x193   : > { %v1774_v49 = vpack.c.bf16 %v1837_v48, %v1837_v48 }
 0x194   : > { %v495_v50 = vpop.f32.mrf.mxu1 }
 0x195   : > { %584 = vst.msk [vmem:[#allocation2 + $0x3c] sm:$0xf] %vm568_vm4, %v1774_v49  ;;  %v1773_v51 = vpack.c.bf16 %v495_v50, %v495_v50 }
 0x197   : > { %583 = vst.msk [vmem:[#allocation2 + $0x38] sm:$0xf] %vm568_vm4, %v1773_v51 }
 0x198 PF: > { %v620_v52 = vld [vmem:[%s2193_s10] sm:$0x7]  ;;  %vm625_vm5 = vcmask 1042432   ;;  %vm621_vm6 = vcmask 23552   ;;  %v2111_v53 = vmov 0.0   ;;  %vm2112_vm7 = vmmov 0  }
 0x199   : > { %1838 = vmatprep.subr.mxu1 %v2111_v53  ;;  %1840 = vmatprep.mubr.msk.f32.mxu1 %vm2112_vm7, %v2111_v53  ;;  %v619_v54 = vld [vmem:[%s2564_s1] sm:$0x3f]  ;;  %vm785_vm8 = vcmask 1040384   ;;  %vm786_vm9 = vcmask 1041408   ;;  %v2113_v56 = vmov 65535   ;;  %v1948_v2 = vld [vmem:[#allocation2 + $0x8] sm:$0xff]   ;;  %v890_v9 = vlaneseq }
 0x19a   : > { %1839 = vmatpush3.msk.msra.mxu1 %vm625_vm5, %v620_v52  ;;  %v1947_v55 = vld [vmem:[#allocation2] sm:$0xff]   ;;  %v787_v57 = vsel %vm785_vm8, 4294967295, %v2113_v56  ;;  %v1949_v3 = vld [vmem:[#allocation2 + $0x10] sm:$0xff]   ;;  %v1950_v4 = vld [vmem:[#allocation2 + $0x18] sm:$0xff]   ;;  %s1755_s26 = sshll.u32 %s2083_s15, 7  ;;  %v2114_v26 = vmov 0  }
 0x19b   : > { %1841 = vmatmul.mubr.msk.f32.vlgmr.msra.gmra.mxu1 %vm621_vm6, %v619_v54  ;;  %v788_v59 = vsel %vm786_vm9, %v787_v57, 0  ;;  %v1951_v5 = vld [vmem:[#allocation2 + $0x20] sm:$0xff]   ;;  %v1952_v6 = vld [vmem:[#allocation2 + $0x28] sm:$0xff]   ;;  %v1953_v7 = vld [vmem:[#allocation2 + $0x30] sm:$0xff]   ;;  %v891_v10 = vand.u32 127, %v890_v9  ;;  %v892_v11 = vstv %s1755_s26  ;;  %1946 = vset.pattern.permute.xlu1 %v2114_v26  ;;  %vm1403_vm11 = vcmask 7168  }
 0x19c   : > { %1845 = vmatprep.mubr.msk.bf16.mxu1 %vm621_vm6, %v1947_v55  ;;  %1945 = vset.pattern.permute.xlu0 %v2114_v26  ;;  %v2348_v46 = vld [vmem:[#allocation3 + $0x10] sm:$0xff]  ;;  %v2350_v48 = vld [vmem:[#allocation3] sm:$0xff]  ;;  %v916_v51 = vld [vmem:[#allocation3 + $0x18] sm:$0xff]  ;;  %vm1386_vm12 = vcmask 31744   ;;  %p1756_p10 = scmp.ne.s32.totalorder %s2083_s15, 2 }
 0x19d   : > { %v893_v12 = vadd.s32 %v892_v11, %v891_v10  ;;  %v914_v54 = vld [vmem:[#allocation3 + $0x8] sm:$0xff]  ;;  %v2391_v11 = vld [vmem:[#allocation3 + $0x50] sm:$0xff] }
 0x19e   : > { %v1954_v8 = vld [vmem:[#allocation2 + $0x38] sm:$0xff]  }
 0x19f   : > { %vm894_vm10 = vcmp.lt.s32.totalorder %v893_v12, 300 }
 0x25b   : > { %v695_v58 = vpop.f32.mrf.mxu1 }
 0x25c   : > { %v699_v60 = vpack.c.bf16 %v695_v58, %v695_v58  ;;  %v701_v61 = vrot.slane %v695_v58, 3  ;;  %v2365_v58 = vld [vmem:[#allocation3 + $0x20] sm:$0xff] }
 0x25d   : > { %v1842_v62 = vpop.f32.mrf.mxu1 }
 0x25e   : > { %v790_v63 = vand.u32 %v788_v59, %v699_v60  ;;  %v703_v0 = vsel %vm625_vm5, %v701_v61, 1.0  ;;  %v920_v60 = vld [vmem:[#allocation3 + $0x38] sm:$0xff] }
 0x25f   : > { %v704_v1 = vpack.c.bf16 %v703_v0, %v703_v0 }
 0x260   : > { %1843 = vmatprep.subr.bf16.mxu1 %v790_v63 }
 0x261   : > { %1844 = vmatpush3.bf16.msra.mxu1 %v790_v63  ;;  %1861 = vmatprep.subr.bf16.mxu0 %v704_v1  ;;  %v2371_v63 = vld [vmem:[#allocation3 + $0x30] sm:$0xff] }
 0x262   : > { %1862 = vmatpush3.bf16.xpose.msra.mxu0 %v704_v1 }
 0x264   : > { %1846 = vmatmul.mubr.msk.bf16.vlgmr.msra.gmra.mxu1 %vm621_vm6, %v1948_v2  ;;  %v2375_v2 = vld [vmem:[#allocation3 + $0x28] sm:$0xff] }
 0x265   : > { %1849 = vmatprep.mubr.msk.bf16.mxu1 %vm621_vm6, %v1949_v3 }
 0x26c   : > { %1850 = vmatmul.mubr.msk.bf16.gmra.mxu1 %vm621_vm6, %v1950_v4 }
 0x26d   : > { %1853 = vmatprep.mubr.msk.bf16.mxu1 %vm621_vm6, %v1951_v5  ;;  %v2381_v5 = vld [vmem:[#allocation3 + $0x40] sm:$0xff] }
 0x274   : > { %1854 = vmatmul.mubr.msk.bf16.gmra.mxu1 %vm621_vm6, %v1952_v6 }
 0x275   : > { %1857 = vmatprep.mubr.msk.bf16.mxu1 %vm621_vm6, %v1953_v7 }
 0x27c   : > { %1858 = vmatmul.mubr.msk.bf16.gmra.mxu1 %vm621_vm6, %v1954_v8  ;;  %v924_v8 = vld [vmem:[#allocation3 + $0x58] sm:$0xff] }
 0x324   : > { %v1847_v13 = vpop.f32.mrf.mxu1 }
 0x325   : > { %v2285_v14 = vsel %vm894_vm10, %v1847_v13, -1e+30 }
 0x326   : > { %933 = vmax.xlane.f32.xlu1 %v2285_v14  ;;  %v826_v15 = vpop.f32.mrf.mxu1 }
 0x327   : > { %v2289_v16 = vsel %vm894_vm10, %v826_v15, -1e+30 }
 0x328   : > { %929 = vmax.xlane.f32.xlu0 %v2289_v16  ;;  %v1848_v17 = vpop.f32.mrf.mxu1 }
 0x329   : > { %v2293_v18 = vsel %vm894_vm10, %v1848_v17, -1e+30  ;;  %v922_v17 = vld [vmem:[#allocation3 + $0x48] sm:$0xff] }
 0x32a   : > { %935 = vmax.xlane.f32.xlu1 %v2293_v18  ;;  %v829_v19 = vpop.f32.mrf.mxu1 }
 0x32b   : > { %v2297_v20 = vsel %vm894_vm10, %v829_v19, -1e+30 }
 0x32c   : > { %931 = vmax.xlane.f32.xlu0 %v2297_v20  ;;  %v1851_v21 = vpop.f32.mrf.mxu1 }
 0x32d   : > { %v2309_v28 = vsel %vm894_vm10, %v1851_v21, -1e+30 }
 0x32e   : > { %v842_v22 = vpop.f32.mrf.mxu1 }
 0x32f   : > { %v2301_v23 = vsel %vm894_vm10, %v842_v22, -1e+30  ;;  %v2400_v22 = vld [vmem:[#allocation3 + $0x60] sm:$0xff] }
 0x330   : > { %937 = vmax.xlane.f32.xlu0 %v2301_v23  ;;  %v1852_v24 = vpop.f32.mrf.mxu1 }
 0x331   : > { %v2305_v25 = vsel %vm894_vm10, %v1852_v24, -1e+30 }
 0x332   : > { %943 = vmax.xlane.f32.xlu1 %v2305_v25  ;;  %v845_v27 = vpop.f32.mrf.mxu1 }
 0x333   : > { %v2313_v30 = vsel %vm894_vm10, %v845_v27, -1e+30 }
 0x334   : > { %941 = vmax.xlane.f32.xlu0 %v2309_v28  ;;  %v1855_v29 = vpop.f32.mrf.mxu1 }
 0x335   : > { %v2324_v35 = vsel %vm894_vm10, %v1855_v29, -1e+30 }
 0x336   : > { %939 = vmax.xlane.f32.xlu1 %v2313_v30  ;;  %v858_v31 = vpop.f32.mrf.mxu1 }
 0x337   : > { %v2317_v32 = vsel %vm894_vm10, %v858_v31, -1e+30  ;;  %v2404_v31 = vld [vmem:[#allocation3 + $0x78] sm:$0xff] }
 0x338   : > { %v1856_v33 = vpop.f32.mrf.mxu1  ;;  %945 = vmax.xlane.f32.xlu0 %v2317_v32 }
 0x339   : > { %v2321_v34 = vsel %vm894_vm10, %v1856_v33, -1e+30 }
 0x33a   : > { %951 = vmax.xlane.f32.xlu1 %v2321_v34  ;;  %v861_v36 = vpop.f32.mrf.mxu1 }
 0x33b   : > { %v2329_v38 = vsel %vm894_vm10, %v861_v36, -1e+30 }
 0x33c   : > { %v1859_v37 = vpop.f32.mrf.mxu1  ;;  %949 = vmax.xlane.f32.xlu0 %v2324_v35 }
 0x33d   : > { %v2340_v43 = vsel %vm894_vm10, %v1859_v37, -1e+30 }
 0x33e   : > { %947 = vmax.xlane.f32.xlu1 %v2329_v38  ;;  %v874_v39 = vpop.f32.mrf.mxu1 }
 0x33f   : > { %v2333_v40 = vsel %vm894_vm10, %v874_v39, -1e+30  ;;  %v2412_v39 = vld [vmem:[#allocation3 + $0x70] sm:$0xff] }
 0x340   : > { %v1860_v41 = vpop.f32.mrf.mxu1  ;;  %953 = vmax.xlane.f32.xlu0 %v2333_v40 }
 0x341   : > { %v2337_v42 = vsel %vm894_vm10, %v1860_v41, -1e+30 }
 0x342   : > { %959 = vmax.xlane.f32.xlu1 %v2337_v42  ;;  %v877_v44 = vpop.f32.mrf.mxu1 }
 0x343   : > { %v2345_v45 = vsel %vm894_vm10, %v877_v44, -1e+30 }
 0x344   : > { %957 = vmax.xlane.f32.xlu0 %v2340_v43 }
 0x346   : > { %955 = vmax.xlane.f32.xlu1 %v2345_v45 }
 0x3af   : > { %v934_v47 = vpop.xlane.xlu1 %933 }
 0x3b0   : > { %v2353_v49 = vmax.f32 %v2348_v46, %v934_v47 }
 0x3b1   : > { %v930_v50 = vpop.xlane.xlu0 %929 }
 0x3b2   : > { %1406 = vst.msk [vmem:[#allocation3 + $0x10] sm:$0xff] %vm1403_vm11, %v2353_v49  ;;  %v2358_v52 = vmax.f32 %v2350_v48, %v930_v50  ;;  %1037 = vperm.xlu1 %1946, %v2353_v49  }
 0x3b3   : > { %v936_v53 = vpop.xlane.xlu1 %935 }
 0x3b4   : > { %1404 = vst.msk [vmem:[#allocation3] sm:$0xff] %vm1403_vm11, %v2358_v52  ;;  %v964_v55 = vmax.f32 %v916_v51, %v936_v53  ;;  %1027 = vperm.xlu0 %1945, %v2358_v52   ;;  %v977_v33 = vsub.f32 %v2350_v48, %v2358_v52  ;;  %v926_v48 = vld [vmem:[#allocation3 + $0x68] sm:$0xff] }
 0x3b5   : > { %v932_v56 = vpop.xlane.xlu0 %931 }
 0x3b6   : > { %1407 = vst.msk [vmem:[#allocation3 + $0x18] sm:$0xff] %vm1403_vm11, %v964_v55  ;;  %v962_v57 = vmax.f32 %v914_v54, %v932_v56  ;;  %1042 = vperm.xlu1 %1946, %v964_v55   ;;  %v980_v24 = vsub.f32 %v916_v51, %v964_v55  ;;  %v979_v51 = vsub.f32 %v2348_v46, %v2353_v49  ;;  %v993_v52 = vmul.f32 1.442695, %v977_v33 }
 0x3b8   : > { %1405 = vst.msk [vmem:[#allocation3 + $0x8] sm:$0xff] %vm1403_vm11, %v962_v57  ;;  %v978_v12 = vsub.f32 %v914_v54, %v962_v57  ;;  %v999_v41 = vmul.f32 1.442695, %v980_v24 }
 0x3b9   : > { %v938_v59 = vpop.xlane.xlu0 %937 }
 0x3ba   : > { %v2369_v61 = vmax.f32 %v2365_v58, %v938_v59  ;;  %1032 = vperm.xlu1 %1946, %v962_v57   ;;  %v995_v26 = vmul.f32 1.442695, %v978_v12  ;;  %v997_v59 = vmul.f32 1.442695, %v979_v51 }
 0x3bb   : > { %v944_v62 = vpop.xlane.xlu1 %943 }
 0x3bc   : > { %1408 = vst.msk [vmem:[#allocation3 + $0x20] sm:$0xff] %vm1403_vm11, %v2369_v61  ;;  %v968_v0 = vmax.f32 %v920_v60, %v944_v62  ;;  %1955 = vpow2.f32 %v995_v26  ;;  %v981_v46 = vsub.f32 %v2365_v58, %v2369_v61 }
 0x3bd   : > { %v942_v1 = vpop.xlane.xlu0 %941  ;;  %1957 = vpow2.f32 %v999_v41 }
 0x3be   : > { %1411 = vst.msk [vmem:[#allocation3 + $0x38] sm:$0xff] %vm1403_vm11, %v968_v0  ;;  %v2379_v3 = vmax.f32 %v2371_v63, %v942_v1  ;;  %v984_v44 = vsub.f32 %v920_v60, %v968_v0  ;;  %1959 = vpow2.f32 %v993_v52  ;;  %v1001_v62 = vmul.f32 1.442695, %v981_v46 }
 0x3bf   : > { %v940_v4 = vpop.xlane.xlu1 %939 }
 0x3c0   : > { %1410 = vst.msk [vmem:[#allocation3 + $0x30] sm:$0xff] %vm1403_vm11, %v2379_v3  ;;  %v966_v6 = vmax.f32 %v2375_v2, %v940_v4  ;;  %1057 = vperm.xlu1 %1946, %v2379_v3   ;;  %v1007_v55 = vmul.f32 1.442695, %v984_v44 }
 0x3c1   : > { %v946_v7 = vpop.xlane.xlu0 %945 }
 0x3c2   : > { %1409 = vst.msk [vmem:[#allocation3 + $0x28] sm:$0xff] %vm1403_vm11, %v966_v6  ;;  %v2389_v9 = vmax.f32 %v2381_v5, %v946_v7  ;;  %v982_v56 = vsub.f32 %v2375_v2, %v966_v6  ;;  %1961 = vpow2.f32 %v1007_v55 }
 0x3c3   : > { %v952_v10 = vpop.xlane.xlu1 %951  ;;  %1963 = vpow2.f32 %v997_v59 }
 0x3c4   : > { %1412 = vst.msk [vmem:[#allocation3 + $0x40] sm:$0xff] %vm1403_vm11, %v2389_v9  ;;  %v972_v13 = vmax.f32 %v924_v8, %v952_v10  ;;  %1047 = vperm.xlu1 %1946, %v2369_v61   ;;  %v1003_v49 = vmul.f32 1.442695, %v982_v56 }
 0x3c5   : > { %v950_v15 = vpop.xlane.xlu0 %949 }
 0x3c6   : > { %1415 = vst.msk [vmem:[#allocation3 + $0x58] sm:$0xff] %vm1403_vm11, %v972_v13  ;;  %v2398_v19 = vmax.f32 %v2391_v11, %v950_v15  ;;  %v988_v60 = vsub.f32 %v924_v8, %v972_v13  ;;  %1965 = vpow2.f32 %v1003_v49 }
 0x3c7   : > { %v948_v21 = vpop.xlane.xlu1 %947  ;;  %1967 = vpow2.f32 %v1001_v62 }
 0x3c8   : > { %1414 = vst.msk [vmem:[#allocation3 + $0x50] sm:$0xff] %vm1403_vm11, %v2398_v19  ;;  %v970_v27 = vmax.f32 %v922_v17, %v948_v21  ;;  %1052 = vperm.xlu1 %1946, %v966_v6   ;;  %v1015_v1 = vmul.f32 1.442695, %v988_v60  ;;  %v987_v4 = vsub.f32 %v2391_v11, %v2398_v19 }
 0x3c9   : > { %v954_v29 = vpop.xlane.xlu0 %953  ;;  %v1956_v58 = vpop.eup %1955 }
 0x3ca   : > { %1413 = vst.msk [vmem:[#allocation3 + $0x48] sm:$0xff] %vm1403_vm11, %v970_v27  ;;  %1072 = vperm.xlu0 %1945, %v970_v27   ;;  %v2410_v36 = vmax.f32 %v2400_v22, %v954_v29  ;;  %v986_v2 = vsub.f32 %v922_v17, %v970_v27  ;;  %1969 = vpow2.f32 %v1015_v1  ;;  %v1958_v8 = vpop.eup %1957 }
 0x3cb   : > { %v960_v37 = vpop.xlane.xlu1 %959  ;;  %v1960_v10 = vpop.eup %1959 }
 0x3cc   : > { %1416 = vst.msk [vmem:[#allocation3 + $0x60] sm:$0xff] %vm1403_vm11, %v2410_v36  ;;  %v976_v47 = vmax.f32 %v2404_v31, %v960_v37  ;;  %1062 = vperm.xlu1 %1946, %v968_v0   ;;  %v983_v0 = vsub.f32 %v2371_v63, %v2379_v3  ;;  %v1011_v6 = vmul.f32 1.442695, %v986_v2  ;;  %v985_v63 = vsub.f32 %v2381_v5, %v2389_v9 }
 0x3cd   : > { %v958_v50 = vpop.xlane.xlu0 %957  ;;  %v1013_v3 = vmul.f32 1.442695, %v987_v4  ;;  %v989_v17 = vsub.f32 %v2400_v22, %v2410_v36 }
 0x3ce   : > { %1419 = vst.msk [vmem:[#allocation3 + $0x78] sm:$0xff] %vm1403_vm11, %v976_v47  ;;  %1082 = vperm.xlu0 %1945, %v972_v13   ;;  %v2421_v53 = vmax.f32 %v2412_v39, %v958_v50  ;;  %v1005_v61 = vmul.f32 1.442695, %v983_v0  ;;  %v992_v12 = vsub.f32 %v2404_v31, %v976_v47  ;;  %v1009_v15 = vmul.f32 1.442695, %v985_v63 }
 0x3cf   : > { %v956_v54 = vpop.xlane.xlu1 %955  ;;  %v1962_v11 = vpop.eup %1961 }
 0x3d0   : > { %1418 = vst.msk [vmem:[#allocation3 + $0x70] sm:$0xff] %vm1403_vm11, %v2421_v53  ;;  %v974_v57 = vmax.f32 %v926_v48, %v956_v54  ;;  %1067 = vperm.xlu1 %1946, %v2389_v9   ;;  %1971 = vpow2.f32 %v1005_v61  ;;  %v1023_v21 = vmul.f32 1.442695, %v992_v12  ;;  %v1017_v9 = vmul.f32 1.442695, %v989_v17 }
 0x3d1   : > { %1973 = vpow2.f32 %v1011_v6  ;;  %v991_v24 = vsub.f32 %v2412_v39, %v2421_v53 }
 0x3d2   : > { %1417 = vst.msk [vmem:[#allocation3 + $0x68] sm:$0xff] %vm1403_vm11, %v974_v57  ;;  %1092 = vperm.xlu0 %1945, %v974_v57   ;;  %v990_v7 = vsub.f32 %v926_v48, %v974_v57  ;;  %1975 = vpow2.f32 %v1013_v3 }
 0x3d3   : > { %v1021_v29 = vmul.f32 1.442695, %v991_v24 }
 0x3d4   : > { %1077 = vperm.xlu1 %1946, %v2398_v19   ;;  %v1019_v13 = vmul.f32 1.442695, %v990_v7  ;;  %v1964_v19 = vpop.eup %1963 }
 0x3d5   : > { %v1966_v5 = vpop.eup %1965 }
 0x3d6   : > { %1102 = vperm.xlu0 %1945, %v976_v47   ;;  %1977 = vpow2.f32 %v1019_v13  ;;  %v1968_v26 = vpop.eup %1967 }
 0x3d7   : > { %1979 = vpow2.f32 %v1009_v15  ;;  %v1970_v27 = vpop.eup %1969 }
 0x3d8   : > { %1087 = vperm.xlu1 %1946, %v2410_v36   ;;  %1981 = vpow2.f32 %v1023_v21 }
 0x3d9   : > { %1983 = vpow2.f32 %v1017_v9 }
 0x3da   : > { %1281 = vperm.xlu0 %1945, %v1956_v58   ;;  %1985 = vpow2.f32 %v1021_v29 }
 0x3dc   : > { %1097 = vperm.xlu1 %1946, %v2421_v53  }
 0x3dd   : > { %v1972_v22 = vpop.eup %1971 }
 0x3de   : > { %1291 = vperm.xlu0 %1945, %v1958_v8   ;;  %v1974_v31 = vpop.eup %1973 }
 0x3df   : > { %v1976_v33 = vpop.eup %1975 }
 0x3e0   : > { %1276 = vperm.xlu1 %1946, %v1960_v10  }
 0x3e2   : > { %1311 = vperm.xlu0 %1945, %v1962_v11  }
 0x3e3   : > { %v1978_v36 = vpop.eup %1977 }
 0x3e4   : > { %1286 = vperm.xlu1 %1946, %v1964_v19   ;;  %v1980_v37 = vpop.eup %1979 }
 0x3e5   : > { %v1982_v39 = vpop.eup %1981 }
 0x3e6   : > { %1301 = vperm.xlu0 %1945, %v1966_v5   ;;  %v1984_v41 = vpop.eup %1983 }
 0x3e7   : > { %v1986_v44 = vpop.eup %1985 }
 0x3e8   : > { %1296 = vperm.xlu1 %1946, %v1968_v26  }
 0x3ea   : > { %1331 = vperm.xlu0 %1945, %v1970_v27  }
 0x3ec   : > { %1306 = vperm.xlu1 %1946, %v1972_v22  }
 0x3ee   : > { %1321 = vperm.xlu0 %1945, %v1974_v31  }
 0x3f0   : > { %1326 = vperm.xlu1 %1946, %v1976_v33  }
 0x3f2   : > { %1341 = vperm.xlu0 %1945, %v1978_v36  }
 0x3f4   : > { %1316 = vperm.xlu1 %1946, %v1980_v37  }
 0x3f6   : > { %1351 = vperm.xlu0 %1945, %v1982_v39  }
 0x3f8   : > { %1336 = vperm.xlu1 %1946, %v1984_v41  }
 0x3fc   : > { %1346 = vperm.xlu1 %1946, %v1986_v44  }
 0x42d   : > { %v1038_v47 = vpop.permute.xlu1 %1037 }
 0x42e   : > { %v1107_v53 = vsub.f32 %v2285_v14, %v1038_v47 }
 0x42f   : > { %v1028_v50 = vpop.permute.xlu0 %1027 }
 0x430   : > { %v1105_v48 = vsub.f32 %v2289_v16, %v1028_v50  ;;  %v1125_v59 = vmul.f32 1.442695, %v1107_v53 }
 0x431   : > { %v1043_v51 = vpop.permute.xlu1 %1042 }
 0x432   : > { %v1108_v52 = vsub.f32 %v2293_v18, %v1043_v51  ;;  %v1121_v54 = vmul.f32 1.442695, %v1105_v48 }
 0x434   : > { %v1127_v55 = vmul.f32 1.442695, %v1108_v52  ;;  %1987 = vpow2.f32 %v1121_v54 }
 0x435   : > { %v1033_v56 = vpop.permute.xlu1 %1032 }
 0x436   : > { %v1106_v57 = vsub.f32 %v2297_v20, %v1033_v56  ;;  %1989 = vpow2.f32 %v1127_v55 }
 0x438   : > { %v1123_v46 = vmul.f32 1.442695, %v1106_v57 }
 0x43a   : > { %1991 = vpow2.f32 %v1123_v46  ;;  %v1260_v46 = vld [vmem:[#allocation4 + $0x10] sm:$0xff] }
 0x43b   : > { %1993 = vpow2.f32 %v1125_v59  ;;  %v1058_v49 = vpop.permute.xlu1 %1057 }
 0x43c   : > { %v1111_v62 = vsub.f32 %v2309_v28, %v1058_v49 }
 0x43e   : > { %v1133_v4 = vmul.f32 1.442695, %v1111_v62 }
 0x43f   : > { %v1048_v60 = vpop.permute.xlu1 %1047 }
 0x440   : > { %v1109_v16 = vsub.f32 %v2301_v23, %v1048_v60  ;;  %v1258_v60 = vld [vmem:[#allocation4] sm:$0xff] }
 0x441   : > { %v1988_v1 = vpop.eup %1987 }
 0x442   : > { %v1129_v18 = vmul.f32 1.442695, %v1109_v16 }
 0x443   : > { %v1053_v0 = vpop.permute.xlu1 %1052  ;;  %v1990_v58 = vpop.eup %1989 }
 0x444   : > { %v1110_v14 = vsub.f32 %v2313_v30, %v1053_v0  ;;  %1995 = vpow2.f32 %v1129_v18  ;;  %v1261_v18 = vld [vmem:[#allocation4 + $0x18] sm:$0xff] }
 0x445   : > { %v1073_v2 = vpop.permute.xlu0 %1072 }
 0x446   : > { %v1131_v20 = vmul.f32 1.442695, %v1110_v14  ;;  %v1114_v6 = vsub.f32 %v2329_v38, %v1073_v2  ;;  %v1259_v2 = vld [vmem:[#allocation4 + $0x8] sm:$0xff] }
 0x447   : > { %v1992_v61 = vpop.eup %1991  ;;  %v1063_v7 = vpop.permute.xlu1 %1062 }
 0x448   : > { %v1994_v8 = vpop.eup %1993  ;;  %1997 = vpow2.f32 %v1131_v20  ;;  %v1112_v23 = vsub.f32 %v2305_v25, %v1063_v7  ;;  %v1153_v63 = vpack.c.bf16 %v1992_v61, %v1988_v1  ;;  %v1139_v30 = vmul.f32 1.442695, %v1114_v6 }
 0x449   : > { %v1083_v28 = vpop.permute.xlu0 %1082  ;;  %v1154_v3 = vpack.c.bf16 %v1990_v58, %v1994_v8  ;;  %1999 = vpow2.f32 %v1133_v4 }
 0x44a   : > { %v1135_v10 = vmul.f32 1.442695, %v1112_v23  ;;  %1863 = vmatprep.mubr.bf16.mxu0 %v1153_v63  ;;  %v1116_v12 = vsub.f32 %v2321_v34, %v1083_v28 }
 0x44b   : > { %1864 = vmatmul.mubr.bf16.vlgmr.msra.gmra.mxu0 %v1154_v3  ;;  %v1068_v13 = vpop.permute.xlu1 %1067 }
 0x44c   : > { %2001 = vpow2.f32 %v1135_v10  ;;  %v1113_v11 = vsub.f32 %v2317_v32, %v1068_v13  ;;  %v1143_v17 = vmul.f32 1.442695, %v1116_v12  ;;  %v1262_v12 = vld [vmem:[#allocation4 + $0x20] sm:$0xff] }
 0x44d   : > { %v1093_v38 = vpop.permute.xlu0 %1092  ;;  %2003 = vpow2.f32 %v1139_v30  ;;  %v1264_v30 = vld [vmem:[#allocation4 + $0x30] sm:$0xff] }
 0x44e   : > { %v1137_v15 = vmul.f32 1.442695, %v1113_v11  ;;  %v1118_v25 = vsub.f32 %v2345_v45, %v1093_v38  ;;  %v1265_v38 = vld [vmem:[#allocation4 + $0x38] sm:$0xff] }
 0x44f   : > { %v1078_v19 = vpop.permute.xlu1 %1077 }
 0x450   : > { %2005 = vpow2.f32 %v1137_v15  ;;  %v1115_v21 = vsub.f32 %v2324_v35, %v1078_v19  ;;  %v1147_v24 = vmul.f32 1.442695, %v1118_v25 }
 0x451   : > { %v1103_v5 = vpop.permute.xlu0 %1102  ;;  %2007 = vpow2.f32 %v1143_v17  ;;  %v1996_v27 = vpop.eup %1995 }
 0x452   : > { %v1141_v9 = vmul.f32 1.442695, %v1115_v21  ;;  %v1120_v34 = vsub.f32 %v2337_v42, %v1103_v5  ;;  %v1263_v21 = vld [vmem:[#allocation4 + $0x28] sm:$0xff] }
 0x453   : > { %v1088_v26 = vpop.permute.xlu1 %1087 }
 0x454   : > { %2009 = vpow2.f32 %v1141_v9  ;;  %v1117_v32 = vsub.f32 %v2333_v40, %v1088_v26  ;;  %v1151_v45 = vmul.f32 1.442695, %v1120_v34  ;;  %v1268_v26 = vld [vmem:[#allocation4 + $0x50] sm:$0xff] }
 0x455   : > { %v1998_v29 = vpop.eup %1997  ;;  %2011 = vpow2.f32 %v1147_v24  ;;  %v1282_v57 = vpop.permute.xlu0 %1281 }
 0x456   : > { %v1145_v22 = vmul.f32 1.442695, %v1117_v32  ;;  %v1155_v31 = vpack.c.bf16 %v1998_v29, %v1996_v27  ;;  %v2000_v36 = vpop.eup %1999  ;;  %v1355_v7 = vmul.f32 %v1282_v57, %v1259_v2 }
 0x457   : > { %v1098_v33 = vpop.permute.xlu1 %1097 }
 0x458   : > { %2013 = vpow2.f32 %v1145_v22  ;;  %v1119_v35 = vsub.f32 %v2340_v43, %v1098_v33  ;;  %1867 = vmatprep.mubr.bf16.mxu0 %v1155_v31  ;;  %v1266_v22 = vld [vmem:[#allocation4 + $0x40] sm:$0xff] }
 0x459   : > { %v2002_v37 = vpop.eup %2001  ;;  %2015 = vpow2.f32 %v1151_v45  ;;  %v1292_v49 = vpop.permute.xlu0 %1291 }
 0x45a   : > { %v1149_v39 = vmul.f32 1.442695, %v1119_v35  ;;  %v1156_v41 = vpack.c.bf16 %v2002_v37, %v2000_v36  ;;  %v2004_v42 = vpop.eup %2003  ;;  %v1357_v20 = vmul.f32 %v1292_v49, %v1261_v18  ;;  %v1269_v35 = vld [vmem:[#allocation4 + $0x58] sm:$0xff] }
 0x45b   : > { %v1277_v56 = vpop.permute.xlu1 %1276 }
 0x45c   : > { %2017 = vpow2.f32 %v1149_v39  ;;  %1868 = vmatmul.mubr.bf16.gmra.mxu0 %v1156_v41  ;;  %v1354_v14 = vmul.f32 %v1277_v56, %v1258_v60 }
 0x45d   : > { %v2006_v44 = vpop.eup %2005  ;;  %v1312_v61 = vpop.permute.xlu0 %1311 }
 0x45e   : > { %v1157_v40 = vpack.c.bf16 %v2004_v42, %v2006_v44  ;;  %v2008_v47 = vpop.eup %2007  ;;  %v1361_v9 = vmul.f32 %v1312_v61, %v1265_v38  ;;  %v1267_v42 = vld [vmem:[#allocation4 + $0x48] sm:$0xff] }
 0x45f   : > { %v1287_v59 = vpop.permute.xlu1 %1286 }
 0x460   : > { %1871 = vmatprep.mubr.bf16.mxu0 %v1157_v40  ;;  %v1356_v16 = vmul.f32 %v1287_v59, %v1260_v46  ;;  %v1273_v59 = vld [vmem:[#allocation4 + $0x78] sm:$0xff] }
 0x461   : > { %v2010_v50 = vpop.eup %2009  ;;  %v1302_v3 = vpop.permute.xlu0 %1301 }
 0x462   : > { %v1158_v48 = vpack.c.bf16 %v2008_v47, %v2010_v50  ;;  %v2012_v51 = vpop.eup %2011  ;;  %v1359_v32 = vmul.f32 %v1302_v3, %v1263_v21 }
 0x463   : > { %v1297_v62 = vpop.permute.xlu1 %1296 }
 0x464   : > { %1872 = vmatmul.mubr.bf16.gmra.mxu0 %v1158_v48  ;;  %v1358_v25 = vmul.f32 %v1297_v62, %v1262_v12  ;;  %v1272_v48 = vld [vmem:[#allocation4 + $0x70] sm:$0xff]  ;;  %v1271_v62 = vld [vmem:[#allocation4 + $0x68] sm:$0xff] }
 0x465   : > { %v2014_v52 = vpop.eup %2013  ;;  %v1332_v13 = vpop.permute.xlu0 %1331 }
 0x466   : > { %v1159_v53 = vpack.c.bf16 %v2012_v51, %v2014_v52  ;;  %v2016_v54 = vpop.eup %2015  ;;  %v1365_v47 = vmul.f32 %v1332_v13, %v1269_v35 }
 0x467   : > { %v1307_v8 = vpop.permute.xlu1 %1306 }
 0x468   : > { %1875 = vmatprep.mubr.bf16.mxu0 %v1159_v53  ;;  %v1360_v11 = vmul.f32 %v1307_v8, %v1264_v30 }
 0x469   : > { %v2018_v43 = vpop.eup %2017  ;;  %v1322_v34 = vpop.permute.xlu0 %1321 }
 0x46a   : > { %v1160_v55 = vpack.c.bf16 %v2016_v54, %v2018_v43  ;;  %v1363_v53 = vmul.f32 %v1322_v34, %v1267_v42  ;;  %v1270_v43 = vld [vmem:[#allocation4 + $0x60] sm:$0xff] }
 0x46b   : > { %v1327_v10 = vpop.permute.xlu1 %1326 }
 0x46c   : > { %1876 = vmatmul.mubr.bf16.gmra.mxu0 %v1160_v55  ;;  %v1364_v33 = vmul.f32 %v1327_v10, %v1268_v26 }
 0x46d   : > { %v1342_v44 = vpop.permute.xlu0 %1341 }
 0x46e   : > { %v1367_v2 = vmul.f32 %v1342_v44, %v1271_v62 }
 0x46f   : > { %v1317_v15 = vpop.permute.xlu1 %1316 }
 0x470   : > { %v1362_v39 = vmul.f32 %v1317_v15, %v1266_v22 }
 0x471   : > { %v1352_v46 = vpop.permute.xlu0 %1351 }
 0x473   : > { %v1337_v31 = vpop.permute.xlu1 %1336 }
 0x474   : > { %v1366_v60 = vmul.f32 %v1337_v31, %v1270_v43 }
 0x477   : > { %v1347_v51 = vpop.permute.xlu1 %1346 }
 0x478   : > { %v1368_v56 = vmul.f32 %v1347_v51, %v1272_v48 }
 0x50b   : > { %v1865_v0 = vpop.f32.mrf.mxu0 }
 0x50c   : > { %v1372_v1 = vadd.f32 %v1865_v0, %v1356_v16  ;;  %v1369_v0 = vmul.f32 %v1352_v46, %v1273_v59 }
 0x50d   : > { %v1195_v58 = vpop.f32.mrf.mxu0 }
 0x50e   : > { %1389 = vst.msk [vmem:[#allocation4 + $0x10] sm:$0xff] %vm1386_vm12, %v1372_v1  ;;  %v1370_v4 = vadd.f32 %v1354_v14, %v1195_v58 }
 0x50f   : > { %v1866_v6 = vpop.f32.mrf.mxu0 }
 0x510   : > { %1387 = vst.msk [vmem:[#allocation4] sm:$0xff] %vm1386_vm12, %v1370_v4  ;;  %v1373_v23 = vadd.f32 %v1866_v6, %v1357_v20 }
 0x511   : > { %v1198_v63 = vpop.f32.mrf.mxu0 }
 0x512   : > { %1390 = vst.msk [vmem:[#allocation4 + $0x18] sm:$0xff] %vm1386_vm12, %v1373_v23  ;;  %v1371_v28 = vadd.f32 %v1355_v7, %v1198_v63 }
 0x514   : > { %1388 = vst.msk [vmem:[#allocation4 + $0x8] sm:$0xff] %vm1386_vm12, %v1371_v28 }
 0x51c   : > { %v1869_v17 = vpop.f32.mrf.mxu0 }
 0x51d   : > { %v1376_v19 = vadd.f32 %v1869_v17, %v1360_v11 }
 0x51e   : > { %v1211_v5 = vpop.f32.mrf.mxu0 }
 0x51f   : > { %1393 = vst.msk [vmem:[#allocation4 + $0x30] sm:$0xff] %vm1386_vm12, %v1376_v19  ;;  %v1374_v24 = vadd.f32 %v1358_v25, %v1211_v5 }
 0x520   : > { %v1870_v27 = vpop.f32.mrf.mxu0 }
 0x521   : > { %1391 = vst.msk [vmem:[#allocation4 + $0x20] sm:$0xff] %vm1386_vm12, %v1374_v24  ;;  %v1377_v29 = vadd.f32 %v1870_v27, %v1361_v9 }
 0x522   : > { %v1214_v45 = vpop.f32.mrf.mxu0 }
 0x523   : > { %1394 = vst.msk [vmem:[#allocation4 + $0x38] sm:$0xff] %vm1386_vm12, %v1377_v29  ;;  %v1375_v36 = vadd.f32 %v1359_v32, %v1214_v45 }
 0x524   : > { %v1873_v37 = vpop.f32.mrf.mxu0 }
 0x525   : > { %1392 = vst.msk [vmem:[#allocation4 + $0x28] sm:$0xff] %vm1386_vm12, %v1375_v36  ;;  %v1380_v41 = vadd.f32 %v1873_v37, %v1364_v33 }
 0x526   : > { %v1227_v40 = vpop.f32.mrf.mxu0 }
 0x527   : > { %1397 = vst.msk [vmem:[#allocation4 + $0x50] sm:$0xff] %vm1386_vm12, %v1380_v41  ;;  %v1378_v50 = vadd.f32 %v1362_v39, %v1227_v40 }
 0x528   : > { %v1874_v52 = vpop.f32.mrf.mxu0 }
 0x529   : > { %1395 = vst.msk [vmem:[#allocation4 + $0x40] sm:$0xff] %vm1386_vm12, %v1378_v50  ;;  %v1381_v54 = vadd.f32 %v1874_v52, %v1365_v47 }
 0x52a   : > { %v1230_v55 = vpop.f32.mrf.mxu0 }
 0x52b   : > { %1398 = vst.msk [vmem:[#allocation4 + $0x58] sm:$0xff] %vm1386_vm12, %v1381_v54  ;;  %v1379_v57 = vadd.f32 %v1363_v53, %v1230_v55 }
 0x52c   : > { %v1877_v49 = vpop.f32.mrf.mxu0 }
 0x52d   : > { %1396 = vst.msk [vmem:[#allocation4 + $0x48] sm:$0xff] %vm1386_vm12, %v1379_v57  ;;  %v1384_v16 = vadd.f32 %v1877_v49, %v1368_v56 }
 0x52e   : > { %v1243_v18 = vpop.f32.mrf.mxu0 }
 0x52f   : > { %1401 = vst.msk [vmem:[#allocation4 + $0x70] sm:$0xff] %vm1386_vm12, %v1384_v16  ;;  %v1382_v14 = vadd.f32 %v1366_v60, %v1243_v18 }
 0x530   : > { %v1878_v1 = vpop.f32.mrf.mxu0 }
 0x531   : > { %1399 = vst.msk [vmem:[#allocation4 + $0x60] sm:$0xff] %vm1386_vm12, %v1382_v14  ;;  %v1385_v58 = vadd.f32 %v1878_v1, %v1369_v0  ;;  %1423 = sbr.rel (%p1756_p10) target bundleno = 1602 (0x642), region = 44 }
 0x532   : > { %v1246_v20 = vpop.f32.mrf.mxu0 }
 0x533   : > { %1402 = vst.msk [vmem:[#allocation4 + $0x78] sm:$0xff] %vm1386_vm12, %v1385_v58  ;;  %v1383_v61 = vadd.f32 %v1367_v2, %v1246_v20 }
 0x535   : > { %1400 = vst.msk [vmem:[#allocation4 + $0x68] sm:$0xff] %vm1386_vm12, %v1383_v61 }
 0x536   : > { %v2477_v4 = vld [vmem:[#allocation4 + $0x10] sm:$0xff]  ;;  %v2479_v6 = vld [vmem:[#allocation4] sm:$0xff]  ;;  %v2481_v7 = vld [vmem:[#allocation4 + $0x18] sm:$0xff]  ;;  %v2115_v8 = vmov 3  }
 0x537   : > { %2020 = vset.pattern.permute.xlu1 %v2115_v8  ;;  %2019 = vset.pattern.permute.xlu0 %v2115_v8  ;;  %2021 = vrcp.f32 %v2477_v4  ;;  %v2484_v23 = vld [vmem:[#allocation4 + $0x8] sm:$0xff]  ;;  %v2491_v28 = vld [vmem:[#allocation4 + $0x20] sm:$0xff]  ;;  %v2495_v3 = vld [vmem:[#allocation4 + $0x38] sm:$0xff] }
 0x538   : > { %2023 = vrcp.f32 %v2479_v6  ;;  %v2489_v63 = vld [vmem:[#allocation4 + $0x28] sm:$0xff]  ;;  %v2497_v10 = vld [vmem:[#allocation4 + $0x30] sm:$0xff]  ;;  %v2503_v12 = vld [vmem:[#allocation4 + $0x40] sm:$0xff] }
 0x539   : > { %2025 = vrcp.f32 %v2481_v7  ;;  %v2501_v30 = vld [vmem:[#allocation4 + $0x48] sm:$0xff]  ;;  %v2507_v15 = vld [vmem:[#allocation4 + $0x58] sm:$0xff]  ;;  %v2509_v25 = vld [vmem:[#allocation4 + $0x50] sm:$0xff] }
 0x53a   : > { %2027 = vrcp.f32 %v2484_v23  ;;  %v2515_v9 = vld [vmem:[#allocation4 + $0x60] sm:$0xff]  ;;  %v2519_v34 = vld [vmem:[#allocation4 + $0x78] sm:$0xff]  ;;  %v2521_v27 = vld [vmem:[#allocation4 + $0x70] sm:$0xff] }
 0x53b   : > { %2029 = vrcp.f32 %v2489_v63 }
 0x53c   : > { %2031 = vrcp.f32 %v2491_v28  ;;  %v2513_v21 = vld [vmem:[#allocation4 + $0x68] sm:$0xff] }
 0x53d   : > { %2033 = vrcp.f32 %v2495_v3 }
 0x53e   : > { %2035 = vrcp.f32 %v2497_v10 }
 0x53f   : > { %2037 = vrcp.f32 %v2501_v30 }
 0x540   : > { %2039 = vrcp.f32 %v2503_v12 }
 0x541   : > { %2041 = vrcp.f32 %v2507_v15 }
 0x542   : > { %2043 = vrcp.f32 %v2509_v25 }
 0x543   : > { %2045 = vrcp.f32 %v2513_v21 }
 0x544   : > { %v2022_v13 = vpop.eup %2021  ;;  %2047 = vrcp.f32 %v2515_v9 }
 0x545   : > { %v2024_v11 = vpop.eup %2023  ;;  %1468 = vperm.xlu1 %2020, %v2022_v13   ;;  %2049 = vrcp.f32 %v2519_v34 }
 0x546   : > { %v2026_v38 = vpop.eup %2025  ;;  %1458 = vperm.xlu0 %2019, %v2024_v11   ;;  %2051 = vrcp.f32 %v2521_v27 }
 0x547   : > { %v2028_v17 = vpop.eup %2027 }
 0x548   : > { %v2030_v19 = vpop.eup %2029 }
 0x549   : > { %1473 = vperm.xlu1 %2020, %v2026_v38   ;;  %v2032_v5 = vpop.eup %2031 }
 0x54a   : > { %1463 = vperm.xlu0 %2019, %v2028_v17   ;;  %v2034_v24 = vpop.eup %2033 }
 0x54b   : > { %v2036_v26 = vpop.eup %2035 }
 0x54c   : > { %v2038_v32 = vpop.eup %2037 }
 0x54d   : > { %1483 = vperm.xlu1 %2020, %v2030_v19   ;;  %v2040_v29 = vpop.eup %2039 }
 0x54e   : > { %1478 = vperm.xlu0 %2019, %v2032_v5   ;;  %v2042_v22 = vpop.eup %2041 }
 0x54f   : > { %v2044_v31 = vpop.eup %2043 }
 0x550   : > { %v2046_v45 = vpop.eup %2045 }
 0x551   : > { %1493 = vperm.xlu1 %2020, %v2034_v24   ;;  %v2048_v33 = vpop.eup %2047 }
 0x552   : > { %1488 = vperm.xlu0 %2019, %v2036_v26   ;;  %v2050_v36 = vpop.eup %2049 }
 0x553   : > { %v2052_v35 = vpop.eup %2051 }
 0x555   : > { %1503 = vperm.xlu1 %2020, %v2038_v32  }
 0x556   : > { %1498 = vperm.xlu0 %2019, %v2040_v29  }
 0x559   : > { %1513 = vperm.xlu1 %2020, %v2042_v22  }
 0x55a   : > { %1508 = vperm.xlu0 %2019, %v2044_v31  }
 0x55d   : > { %1523 = vperm.xlu1 %2020, %v2046_v45  }
 0x55e   : > { %1518 = vperm.xlu0 %2019, %v2048_v33  }
 0x561   : > { %1533 = vperm.xlu1 %2020, %v2050_v36  }
 0x562   : > { %1528 = vperm.xlu0 %2019, %v2052_v35  }
 0x5c0   : > { %v1469_v44 = vpop.permute.xlu1 %1468 }
 0x5c1   : > { %v1459_v37 = vpop.permute.xlu0 %1458  ;;  %v1538_v40 = vmul.f32 %v1469_v44, %v2477_v4 }
 0x5c2   : > { %v1536_v39 = vmul.f32 %v1459_v37, %v2479_v6 }
 0x5c4   : > { %1552 = vxpose.xlu0.b32.start [1/16] (narrow) %v1536_v39, 8  ;;  %v1474_v47 = vpop.permute.xlu1 %1473 }
 0x5c5   : > { %v1464_v41 = vpop.permute.xlu0 %1463  ;;  %v1539_v50 = vmul.f32 %v1474_v47, %v2481_v7 }
 0x5c6   : > { %v1537_v42 = vmul.f32 %v1464_v41, %v2484_v23 }
 0x5c8   : > { %1553 = vxpose.xlu0.b32.cont [2/16] (narrow) %v1537_v42, 8  ;;  %v1484_v52 = vpop.permute.xlu1 %1483 }
 0x5c9   : > { %v1479_v48 = vpop.permute.xlu0 %1478  ;;  %v1541_v53 = vmul.f32 %v1484_v52, %v2489_v63 }
 0x5ca   : > { %v1540_v51 = vmul.f32 %v1479_v48, %v2491_v28 }
 0x5cc   : > { %1554 = vxpose.xlu0.b32.cont [3/16] (narrow) %v1538_v40, 8  ;;  %v1494_v55 = vpop.permute.xlu1 %1493 }
 0x5cd   : > { %v1489_v54 = vpop.permute.xlu0 %1488  ;;  %v1543_v56 = vmul.f32 %v1494_v55, %v2495_v3 }
 0x5ce   : > { %v1542_v43 = vmul.f32 %v1489_v54, %v2497_v10 }
 0x5d0   : > { %1555 = vxpose.xlu0.b32.cont [4/16] (narrow) %v1539_v50, 8  ;;  %v1504_v46 = vpop.permute.xlu1 %1503 }
 0x5d1   : > { %v1499_v57 = vpop.permute.xlu0 %1498  ;;  %v1545_v49 = vmul.f32 %v1504_v46, %v2501_v30 }
 0x5d2   : > { %v1544_v59 = vmul.f32 %v1499_v57, %v2503_v12 }
 0x5d4   : > { %1556 = vxpose.xlu0.b32.cont [5/16] (narrow) %v1540_v51, 8  ;;  %v1514_v62 = vpop.permute.xlu1 %1513 }
 0x5d5   : > { %v1509_v60 = vpop.permute.xlu0 %1508  ;;  %v1547_v18 = vmul.f32 %v1514_v62, %v2507_v15 }
 0x5d6   : > { %v1546_v16 = vmul.f32 %v1509_v60, %v2509_v25 }
 0x5d8   : > { %1557 = vxpose.xlu0.b32.cont [6/16] (narrow) %v1541_v53, 8  ;;  %v1524_v1 = vpop.permute.xlu1 %1523 }
 0x5d9   : > { %v1519_v0 = vpop.permute.xlu0 %1518  ;;  %v1549_v2 = vmul.f32 %v1524_v1, %v2513_v21 }
 0x5da   : > { %v1548_v14 = vmul.f32 %v1519_v0, %v2515_v9 }
 0x5dc   : > { %1558 = vxpose.xlu0.b32.cont [7/16] (narrow) %v1542_v43, 8  ;;  %v1534_v61 = vpop.permute.xlu1 %1533 }
 0x5dd   : > { %v1529_v58 = vpop.permute.xlu0 %1528  ;;  %v1551_v4 = vmul.f32 %v1534_v61, %v2519_v34 }
 0x5de   : > { %v1550_v20 = vmul.f32 %v1529_v58, %v2521_v27 }
 0x5e0   : > { %1559 = vxpose.xlu0.b32.cont [8/16] (narrow) %v1543_v56, 8 }
 0x5e4   : > { %1560 = vxpose.xlu0.b32.cont [9/16] (narrow) %v1544_v59, 8 }
 0x5e8   : > { %1561 = vxpose.xlu0.b32.cont [10/16] (narrow) %v1545_v49, 8 }
 0x5ec   : > { %1562 = vxpose.xlu0.b32.cont [11/16] (narrow) %v1546_v16, 8 }
 0x5f0   : > { %1563 = vxpose.xlu0.b32.cont [12/16] (narrow) %v1547_v18, 8 }
 0x5f4   : > { %1564 = vxpose.xlu0.b32.cont [13/16] (narrow) %v1548_v14, 8 }
 0x5f8   : > { %1565 = vxpose.xlu0.b32.cont [14/16] (narrow) %v1549_v2, 8 }
 0x5fc   : > { %1566 = vxpose.xlu0.b32.cont [15/16] (narrow) %v1550_v20, 8 }
 0x600   : > { %1567 = vxpose.xlu0.b32.end [16/16] (narrow) %v1551_v4, 8 }
 0x640   : > { %v1568_v6 = vpop.trf.xlu0 }
 0x641   : > { %1584 = vst [vmem:[%s2198_s13] sm:$0x7] %v1568_v6 }
 0x642 PF: > { %s14_s21 = sadd.s32 1, %s2107_s21   ;;  %s2568_s15 = smov %s2095_s18 }
 0x643   : > { %p11_p11 = scmp.ge.s32.totalorder %s14_s21, 20   ;;  %s2569_s16 = smov %s2099_s19 }
 0x644   : > { %s2570_s17 = smov %s2103_s20  ;;  %s2571_s18 = smov %s2575_s22 }
 0x645   : > { %s2572_s19 = smov %s2579_s23  ;;  %s2573_s20 = smov %s2583_s24 }
 0x646   :  { %13 = sbr.rel (!%p11_p11) target bundleno = 4 (0x4), region = 77 }

</bundles_post_ra>
